<compile_context>
chip_gen: v7x
topology: tpu7x:2x2x1
jax: 0.10.0
libtpu: 0.0.40
codegen_flags: <defaults>
</compile_context>

<pallas_src>
import math
from functools import partial

import jax
import jax.numpy as jnp
from jax.experimental import pallas as pl
from jax.experimental.pallas import tpu as pltpu

NEG_INF = float("-inf")


def _round_up(x, m):
    return (x + m - 1) // m * m


def tiles_mlp_kernel(x_ref, mask_ref, *rest):
    """Fused TilesMLP forward for one tile of flattened (B*N_TILES) rows.

    rest = (w0, b0, w1, b1, ..., wL, bL, out_ref).
    Layers 0..L-1 are MaskedLinear(mask_value='-inf') followed by Sigmoid;
    layer L is the plain final Linear (no mask, no activation).
    """
    out_ref = rest[-1]
    param_refs = rest[:-1]
    n_layers = len(param_refs) // 2

    h = x_ref[...]                          # (TM, F_in), matmul dtype (bf16)
    keep = 1.0 - mask_ref[...]              # (TM, 1) f32; 0.0 where padded

    for li in range(n_layers):
        w = param_refs[2 * li][...]         # (K, N_pad), matmul dtype
        b = param_refs[2 * li + 1][...]     # (1, N_pad), f32
        acc = jnp.dot(h, w, preferred_element_type=jnp.float32) + b
        if li < n_layers - 1:
            # masked_fill(-inf) + Sigmoid  ==  sigmoid(h) * keep  exactly,
            # since sigmoid(-inf) == 0 and keep is {0, 1}.
            acc = jax.nn.sigmoid(acc) * keep
            h = acc.astype(x_ref.dtype)     # back to matmul dtype for next MXU op
        else:
            h = acc                         # final Linear: no mask / activation

    out_ref[...] = h.astype(out_ref.dtype)


def tiles_mlp(x, mask, params, *, block_rows=256, matmul_dtype=jnp.bfloat16):
    """x: (B, N, F_in); mask: (B, N, 1) bool (True = padded); params: [(W, b)].

    W_i stored as (in_features, out_features), b_i as (1, out_features), so
    y = x @ W + b matches PyTorch's Linear (x @ W_pt.T + b).
    """
    assert block_rows % 8 == 0
    B, N, F_in = x.shape
    out_features = params[-1][0].shape[1]

    # ---- flatten rows and pad the row count to a multiple of the row tile ----
    BN = B * N
    TM = min(block_rows, _round_up(BN, 8))
    BN_pad = _round_up(BN, TM)
    grid = (BN_pad // TM,)

    xf = x.reshape(BN, F_in).astype(matmul_dtype)
    mf = mask.reshape(BN, 1).astype(jnp.float32)
    if BN_pad != BN:
        xf = jnp.pad(xf, ((0, BN_pad - BN), (0, 0)))
        mf = jnp.pad(mf, ((0, BN_pad - BN), (0, 0)), constant_values=1.0)

    # ---- pad every layer's output width to a multiple of 128 (lane-dense) ----
    padded = []
    dims_pad = []
    prev_pad = F_in                      # x feature dim is left as-is (full-dim block)
    for (w, b) in params:
        k, n = w.shape
        n_pad = _round_up(n, 128)
        wp = jnp.zeros((prev_pad, n_pad), matmul_dtype).at[:k, :n].set(
            w.astype(matmul_dtype))
        bp = jnp.zeros((1, n_pad), jnp.float32).at[:, :n].set(
            b.astype(jnp.float32))
        padded.append((wp, bp))
        dims_pad.append((prev_pad, n_pad))
        prev_pad = n_pad
    out_pad = padded[-1][0].shape[1]

    # ---- specs ----
    in_specs = [
        pl.BlockSpec((TM, F_in), lambda i: (i, 0)),   # x rows, lane dim = F_in
        pl.BlockSpec((TM, 1), lambda i: (i, 0)),      # per-row pad flag (tiny, contiguous)
    ]
    flat_params = []
    for (wp, bp) in padded:
        flat_params.extend([wp, bp])
        in_specs.append(pl.BlockSpec(wp.shape, lambda i: (0, 0)))  # resident weights
        in_specs.append(pl.BlockSpec(bp.shape, lambda i: (0, 0)))

    out_spec = pl.BlockSpec((TM, out_pad), lambda i: (i, 0))       # lane-dense output

    # ---- advisory cost estimate for the XLA scheduler ----
    flops = 2 * BN_pad * sum(k * n for (k, n) in dims_pad)
    transcendentals = BN_pad * sum(n for (_, n) in dims_pad[:-1])
    bytes_accessed = (
        xf.size * xf.dtype.itemsize
        + mf.size * mf.dtype.itemsize
        + sum(wp.size * wp.dtype.itemsize + bp.size * bp.dtype.itemsize
              for (wp, bp) in padded)
        + BN_pad * out_pad * 4
    )

    out = pl.pallas_call(
        tiles_mlp_kernel,
        out_shape=jax.ShapeDtypeStruct((BN_pad, out_pad), jnp.float32),
        grid=grid,
        in_specs=in_specs,
        out_specs=out_spec,
        compiler_params=pltpu.CompilerParams(
            dimension_semantics=("parallel",),
        ),
        cost_estimate=pl.CostEstimate(
            flops=flops,
            transcendentals=transcendentals,
            bytes_accessed=bytes_accessed,
        ),
    )(xf, mf, *flat_params)

    # Slice back to the real rows / real output features and restore (B, N, F_out).
    return out[:BN, :out_features].reshape(B, N, out_features).astype(x.dtype)


def init_linear_params(key, in_features, out_features):
    """Deterministic PyTorch-style Linear init; weight stored as (in, out)."""
    k_w, k_b = jax.random.split(key)
    bound = 1.0 / math.sqrt(in_features)
    w = jax.random.uniform(k_w, (in_features, out_features), jnp.float32,
                           minval=-bound, maxval=bound)
    b = jax.random.uniform(k_b, (1, out_features), jnp.float32,
                           minval=-bound, maxval=bound)
    return w, b


def ref_tiles_mlp(x, mask, params):
    """Pure-JAX f32 reference mirroring the PyTorch TilesMLP forward."""
    h = x
    for i, (w, b) in enumerate(params):
        h = h @ w + b
        if i < len(params) - 1:
            h = jnp.where(mask, NEG_INF, h)   # MaskedLinear masked_fill('-inf')
            h = jax.nn.sigmoid(h)             # activation (sigmoid(-inf) = 0)
    return h


if __name__ == "__main__":
    # Small shapes consistent with the module's forward:
    #   x: (B, N_TILES, IN_FEATURES), mask: (B, N_TILES, 1)
    B, N_TILES, IN_FEATURES = 2, 16, 32
    HIDDEN = [64, 48]
    OUT_FEATURES = 1

    key = jax.random.PRNGKey(0)
    k_x, k_m, k_p = jax.random.split(key, 3)

    x = jax.random.normal(k_x, (B, N_TILES, IN_FEATURES), jnp.float32)
    # Mark the trailing tiles of each slide as padding.
    n_valid = jnp.array([12, 9])
    tile_idx = jnp.arange(N_TILES)[None, :]
    mask = (tile_idx >= n_valid[:, None])[..., None]        # (B, N_TILES, 1) bool

    # Build parameters: hidden MaskedLinears + final plain Linear.
    dims = [IN_FEATURES] + HIDDEN + [OUT_FEATURES]
    params = []
    pkeys = jax.random.split(k_p, len(dims) - 1)
    for i in range(len(dims) - 1):
        params.append(init_linear_params(pkeys[i], dims[i], dims[i + 1]))

    out = tiles_mlp(x, mask, params)
    out = jax.block_until_ready(out)

    ref = ref_tiles_mlp(x, mask, params)
    assert out.shape == (B, N_TILES, OUT_FEATURES)
    # bf16 matmul inputs with f32 accumulation -> loose-but-meaningful tolerance
    # against the pure-f32 reference.
    max_err = jnp.max(jnp.abs(out - ref))
    assert jnp.allclose(out, ref, atol=5e-2, rtol=5e-2), f"max abs err {max_err}"

    print("KERNEL_OK")
</pallas_src>

<mosaic_0001>
module attributes {stable_mosaic.version = 11 : i64} {
  func.func @tiles_mlp_kernel(%arg0: i32, %arg1: memref<32x32xbf16, #tpu.memory_space<vmem>>, %arg2: memref<32x1xf32, #tpu.memory_space<vmem>>, %arg3: memref<32x128xbf16, #tpu.memory_space<vmem>>, %arg4: memref<1x128xf32, #tpu.memory_space<vmem>>, %arg5: memref<128x128xbf16, #tpu.memory_space<vmem>>, %arg6: memref<1x128xf32, #tpu.memory_space<vmem>>, %arg7: memref<128x128xbf16, #tpu.memory_space<vmem>>, %arg8: memref<1x128xf32, #tpu.memory_space<vmem>>, %arg9: memref<32x128xf32, #tpu.memory_space<vmem>>) attributes {dimension_semantics = [#tpu.dimension_semantics<parallel>], iteration_bounds = array<i64: 1>, scalar_prefetch = 0 : i64, scratch_operands = 0 : i64, tpu.core_type = #tpu.core_type<tc>, window_params = [{transform_indices = @transform_0, window_bounds = array<i64: 32, 32>}, {transform_indices = @transform_1, window_bounds = array<i64: 32, 1>}, {pipeline_mode = #tpu.pipeline_mode<synchronous>, transform_indices = @transform_2, window_bounds = array<i64: 32, 128>}, {pipeline_mode = #tpu.pipeline_mode<synchronous>, transform_indices = @transform_3, window_bounds = array<i64: 1, 128>}, {pipeline_mode = #tpu.pipeline_mode<synchronous>, transform_indices = @transform_4, window_bounds = array<i64: 128, 128>}, {pipeline_mode = #tpu.pipeline_mode<synchronous>, transform_indices = @transform_5, window_bounds = array<i64: 1, 128>}, {pipeline_mode = #tpu.pipeline_mode<synchronous>, transform_indices = @transform_6, window_bounds = array<i64: 128, 128>}, {pipeline_mode = #tpu.pipeline_mode<synchronous>, transform_indices = @transform_7, window_bounds = array<i64: 1, 128>}, {transform_indices = @transform_8, window_bounds = array<i64: 32, 128>}]} {
    %c0 = arith.constant 0 : index
    %c0_0 = arith.constant 0 : index
    %0 = vector.load %arg1[%c0, %c0_0] : memref<32x32xbf16, #tpu.memory_space<vmem>>, vector<32x32xbf16>
    %c0_1 = arith.constant 0 : index
    %c0_2 = arith.constant 0 : index
    %1 = vector.load %arg2[%c0_1, %c0_2] : memref<32x1xf32, #tpu.memory_space<vmem>>, vector<32x1xf32>
    %cst = arith.constant 1.000000e+00 : f32
    %2 = vector.broadcast %cst : f32 to vector<32x1xf32>
    %3 = arith.subf %2, %1 : vector<32x1xf32>
    %c0_3 = arith.constant 0 : index
    %c0_4 = arith.constant 0 : index
    %4 = vector.load %arg3[%c0_3, %c0_4] : memref<32x128xbf16, #tpu.memory_space<vmem>>, vector<32x128xbf16>
    %c0_5 = arith.constant 0 : index
    %c0_6 = arith.constant 0 : index
    %5 = vector.load %arg4[%c0_5, %c0_6] : memref<1x128xf32, #tpu.memory_space<vmem>>, vector<1x128xf32>
    %cst_7 = arith.constant dense<0.000000e+00> : vector<32x128xf32>
    %6 = tpu.matmul %0, %4, %cst_7 {dimension_numbers = #tpu.dot_dimension_numbers<[1], [0], [0], [1], [0, 0, 1, 1], [], []>} : vector<32x32xbf16>, vector<32x128xbf16>, vector<32x128xf32> -> vector<32x128xf32>
    %7 = vector.broadcast %5 : vector<1x128xf32> to vector<32x128xf32>
    %8 = arith.addf %6, %7 : vector<32x128xf32>
    %9 = arith.negf %8 : vector<32x128xf32>
    %10 = math.exp %9 : vector<32x128xf32>
    %cst_8 = arith.constant 1.000000e+00 : f32
    %11 = vector.broadcast %cst_8 : f32 to vector<32x128xf32>
    %12 = arith.addf %11, %10 : vector<32x128xf32>
    %13 = arith.divf %11, %12 : vector<32x128xf32>
    %14 = vector.broadcast %3 : vector<32x1xf32> to vector<32x128xf32>
    %15 = arith.mulf %13, %14 : vector<32x128xf32>
    %16 = arith.truncf %15 : vector<32x128xf32> to vector<32x128xbf16>
    %c0_9 = arith.constant 0 : index
    %c0_10 = arith.constant 0 : index
    %17 = vector.load %arg5[%c0_9, %c0_10] : memref<128x128xbf16, #tpu.memory_space<vmem>>, vector<128x128xbf16>
    %c0_11 = arith.constant 0 : index
    %c0_12 = arith.constant 0 : index
    %18 = vector.load %arg6[%c0_11, %c0_12] : memref<1x128xf32, #tpu.memory_space<vmem>>, vector<1x128xf32>
    %cst_13 = arith.constant dense<0.000000e+00> : vector<32x128xf32>
    %19 = tpu.matmul %16, %17, %cst_13 {dimension_numbers = #tpu.dot_dimension_numbers<[1], [0], [0], [1], [0, 0, 1, 1], [], []>} : vector<32x128xbf16>, vector<128x128xbf16>, vector<32x128xf32> -> vector<32x128xf32>
    %20 = vector.broadcast %18 : vector<1x128xf32> to vector<32x128xf32>
    %21 = arith.addf %19, %20 : vector<32x128xf32>
    %22 = arith.negf %21 : vector<32x128xf32>
    %23 = math.exp %22 : vector<32x128xf32>
    %cst_14 = arith.constant 1.000000e+00 : f32
    %24 = vector.broadcast %cst_14 : f32 to vector<32x128xf32>
    %25 = arith.addf %24, %23 : vector<32x128xf32>
    %26 = arith.divf %24, %25 : vector<32x128xf32>
    %27 = vector.broadcast %3 : vector<32x1xf32> to vector<32x128xf32>
    %28 = arith.mulf %26, %27 : vector<32x128xf32>
    %29 = arith.truncf %28 : vector<32x128xf32> to vector<32x128xbf16>
    %c0_15 = arith.constant 0 : index
    %c0_16 = arith.constant 0 : index
    %30 = vector.load %arg7[%c0_15, %c0_16] : memref<128x128xbf16, #tpu.memory_space<vmem>>, vector<128x128xbf16>
    %c0_17 = arith.constant 0 : index
    %c0_18 = arith.constant 0 : index
    %31 = vector.load %arg8[%c0_17, %c0_18] : memref<1x128xf32, #tpu.memory_space<vmem>>, vector<1x128xf32>
    %cst_19 = arith.constant dense<0.000000e+00> : vector<32x128xf32>
    %32 = tpu.matmul %29, %30, %cst_19 {dimension_numbers = #tpu.dot_dimension_numbers<[1], [0], [0], [1], [0, 0, 1, 1], [], []>} : vector<32x128xbf16>, vector<128x128xbf16>, vector<32x128xf32> -> vector<32x128xf32>
    %33 = vector.broadcast %31 : vector<1x128xf32> to vector<32x128xf32>
    %34 = arith.addf %32, %33 : vector<32x128xf32>
    %c0_20 = arith.constant 0 : index
    %c0_21 = arith.constant 0 : index
    %35 = vector.load %arg9[%c0_20, %c0_21] : memref<32x128xf32, #tpu.memory_space<vmem>>, vector<32x128xf32>
    tpu.vector_store %arg9[%c0_20, %c0_21], %34 {strides = array<i32>} : memref<32x128xf32, #tpu.memory_space<vmem>>, vector<32x128xf32>,
    return
  }
  func.func @transform_0(%arg0: i32) -> (i32, i32) {
    %c0_i32 = arith.constant 0 : i32
    %c0_i32_0 = arith.constant 0 : i32
    return %arg0, %c0_i32 : i32, i32
  }
  func.func @transform_1(%arg0: i32) -> (i32, i32) {
    %c0_i32 = arith.constant 0 : i32
    %c0_i32_0 = arith.constant 0 : i32
    return %arg0, %c0_i32 : i32, i32
  }
  func.func @transform_2(%arg0: i32) -> (i32, i32) {
    %c0_i32 = arith.constant 0 : i32
    %c0_i32_0 = arith.constant 0 : i32
    %c0_i32_1 = arith.constant 0 : i32
    return %c0_i32, %c0_i32_0 : i32, i32
  }
  func.func @transform_3(%arg0: i32) -> (i32, i32) {
    %c0_i32 = arith.constant 0 : i32
    %c0_i32_0 = arith.constant 0 : i32
    %c0_i32_1 = arith.constant 0 : i32
    return %c0_i32, %c0_i32_0 : i32, i32
  }
  func.func @transform_4(%arg0: i32) -> (i32, i32) {
    %c0_i32 = arith.constant 0 : i32
    %c0_i32_0 = arith.constant 0 : i32
    %c0_i32_1 = arith.constant 0 : i32
    return %c0_i32, %c0_i32_0 : i32, i32
  }
  func.func @transform_5(%arg0: i32) -> (i32, i32) {
    %c0_i32 = arith.constant 0 : i32
    %c0_i32_0 = arith.constant 0 : i32
    %c0_i32_1 = arith.constant 0 : i32
    return %c0_i32, %c0_i32_0 : i32, i32
  }
  func.func @transform_6(%arg0: i32) -> (i32, i32) {
    %c0_i32 = arith.constant 0 : i32
    %c0_i32_0 = arith.constant 0 : i32
    %c0_i32_1 = arith.constant 0 : i32
    return %c0_i32, %c0_i32_0 : i32, i32
  }
  func.func @transform_7(%arg0: i32) -> (i32, i32) {
    %c0_i32 = arith.constant 0 : i32
    %c0_i32_0 = arith.constant 0 : i32
    %c0_i32_1 = arith.constant 0 : i32
    return %c0_i32, %c0_i32_0 : i32, i32
  }
  func.func @transform_8(%arg0: i32) -> (i32, i32) {
    %c0_i32 = arith.constant 0 : i32
    %c0_i32_0 = arith.constant 0 : i32
    return %arg0, %c0_i32 : i32, i32
  }
}

</mosaic_0001>

<bundles_post_ra>
// kernel: tpu_custom_call.1
= control target key start
LH: loop header
LB: loop body
LE: loop exit
PB: predicated region body
PF: predicated region fallthrough
CT: control target
= control target key end

     0   :  { %13 = vsyncpa [#allocation3], 0  ;;  %s881_s0 = inlined_call_operand.vmem [shape: bf16[32,32], index: 0, kind: input, shape index: {}]   ;;  %s882_s1 = inlined_call_operand.vmem [shape: f32[32,1], index: 1, kind: input, shape index: {}]   ;;  %s883_s2 = inlined_call_operand.vmem [shape: bf16[32,128], index: 2, kind: input, shape index: {}]   ;;  %s884_s3 = inlined_call_operand.vmem [shape: f32[1,128], index: 3, kind: input, shape index: {}]   ;;  %s885_s4 = inlined_call_operand.hbm [shape: bf16[128,128], index: 4, kind: input, shape index: {}]   ;;  %s886_s5 = inlined_call_operand.vmem [shape: f32[1,128], index: 5, kind: input, shape index: {}]   ;;  %s887_s6 = inlined_call_operand.hbm [shape: bf16[128,128], index: 6, kind: input, shape index: {}]   ;;  %s888_s7 = inlined_call_operand.vmem [shape: f32[1,128], index: 7, kind: input, shape index: {}]   ;;  %s889_s8 = inlined_call_operand.hbm [shape: f32[32,128], index: 8, kind: output, shape index: {}]  }
   0x1   :  { %14 = vsyncpa [#allocation6], 0 }
   0x2   :  { %15 = vsyncpa [#allocation4], 0  ;;  %s741_s27 = smov [#allocation2]   ;;  %s669_s9 = scalar_lea.hbm %s885_s4, 1024 }
   0x3   :  { %s29_s28 = sshll.u32 %s741_s27, 4  ;;  %p670_p0 = scmp.ne.s32.totalorder %s885_s4, %s669_s9  ;;  %s30_s28 = int_to_ptr.vmem [resolvable:$true] %s29_s28 }
   0x4   :  { %p673_p1 = scmp.lt.u32.totalorder %s669_s9, %s885_s4 }
   0x6   :  { %p675_p2 = pnand %p673_p1, %p670_p0 }
   0x8   :  { %678 = shalt.err (!%p675_p2)
}
   0x9   :  { %s679_s14 = scalar_lea.vmem %s30_s28, 1024  ;;  %p684_p4 = scmp.lt.s32.totalorder %s30_s28, %s30_s28 }
   0xa   :  { %p680_p3 = scmp.ne.s32.totalorder %s30_s28, %s679_s14  ;;  %p685_p5 = scmp.lt.s32.totalorder %s679_s14, %s679_s14 }
   0xc   :  { %p686_p6 = por %p685_p5, %p684_p4 }
   0xe   :  { %p687_p7 = pnand %p686_p6, %p680_p3 }
  0x10   :  { %690 = shalt.err (!%p687_p7)
}
  0x11   :  { %s742_s15 = smov 64   ;;  %s743_s16 = smov 4  }
  0x12   :  { %35 = dma.hbm_to_vmem [thread:$0]  %s885_s4, 1024, %s30_s28, [#allocation3], %s742_s15, %s742_s15, %s743_s16  }
  0x13   :  { %s744_s19 = smov [#allocation5]   ;;  %s691_s23 = scalar_lea.hbm %s887_s6, 1024 }
  0x14   :  { %s43_s20 = sshll.u32 %s744_s19, 4  ;;  %p692_p8 = scmp.ne.s32.totalorder %s887_s6, %s691_s23  ;;  %s44_s20 = int_to_ptr.vmem [resolvable:$true] %s43_s20 }
  0x15   :  { %p695_p9 = scmp.lt.u32.totalorder %s691_s23, %s887_s6 }
  0x17   :  { %p697_p10 = pnand %p695_p9, %p692_p8 }
  0x19   :  { %700 = shalt.err (!%p697_p10)
}
  0x1a   :  { %s701_s29 = scalar_lea.vmem %s44_s20, 1024  ;;  %p706_p12 = scmp.lt.s32.totalorder %s44_s20, %s44_s20 }
  0x1b   :  { %p702_p11 = scmp.ne.s32.totalorder %s44_s20, %s701_s29  ;;  %p707_p13 = scmp.lt.s32.totalorder %s701_s29, %s701_s29 }
  0x1d   :  { %p708_p0 = por %p707_p13, %p706_p12 }
  0x1f   :  { %p709_p1 = pnand %p708_p0, %p702_p11 }
  0x21   :  { %712 = shalt.err (!%p709_p1)
}
  0x22   :  { %49 = dma.hbm_to_vmem [thread:$0]  %s887_s6, 1024, %s44_s20, [#allocation6], %s742_s15, %s742_s15, %s743_s16  }
  0x23   :  { %735 = dma.done.wait [#allocation3], 1024  }
  0x24   :  { %736 = vsyncadd [#allocation3], 4294966272 }
  0x25   :  { %737 = dma.done.wait [#allocation6], 1024  }
  0x26   :  { %738 = vsyncadd [#allocation6], 4294966272  ;;  %v745_v0 = vmov 0   ;;  %v617_v1 = vld [vmem:[%s883_s2] sm:$0xff]   ;;  %v618_v2 = vld [vmem:[%s883_s2 + $0x8] sm:$0xff]   ;;  %vm104_vm0 = vcmask 261120  }
  0x27   :  { %615 = vset.pattern.permute.xlu0 %v745_v0  ;;  %616 = vset.pattern.permute.xlu1 %v745_v0  ;;  %v619_v3 = vld [vmem:[%s881_s0] sm:$0xff]   ;;  %v65_v5 = vld [vmem:[%s882_s1 + $0x10] sm:$0xff]  ;;  %v64_v6 = vld [vmem:[%s882_s1 + $0x8] sm:$0xff]  ;;  %s746_s24 = smov [#allocation7]  }
  0x28   :  { %559 = vmatprep.subr.bf16.mxu0 %v617_v1  ;;  %563 = vmatprep.mubr.msk.bf16.mxu0 %vm104_vm0, %v619_v3  ;;  %v63_v4 = vld [vmem:[%s882_s1] sm:$0xff]  ;;  %v620_v7 = vld [vmem:[%s881_s0 + $0x8] sm:$0xff]   ;;  %v69_v9 = vsub.f32 1.0, %v65_v5  ;;  %v66_v10 = vld [vmem:[%s882_s1 + $0x18] sm:$0xff]  ;;  %v68_v11 = vsub.f32 1.0, %v64_v6  ;;  %s489_s25 = sshll.u32 %s746_s24, 4  ;;  %s490_s25 = int_to_ptr.vmem [resolvable:$true] %s489_s25 }
  0x29   :  { %560 = vmatpush3.bf16.msra.mxu0 %v617_v1  ;;  %v67_v8 = vsub.f32 1.0, %v63_v4  ;;  %v70_v12 = vsub.f32 1.0, %v66_v10  ;;  %v621_v13 = vld [vmem:[#allocation2] sm:$0xff]   ;;  %v622_v14 = vld [vmem:[#allocation2 + $0x8] sm:$0xff]   ;;  %v623_v15 = vld [vmem:[#allocation2 + $0x10] sm:$0xff]   ;;  %s713_s26 = scalar_lea.vmem %s490_s25, 512  ;;  %p718_p3 = scmp.lt.s32.totalorder %s490_s25, %s490_s25 }
  0x2a   :  { %561 = vmatprep.subr.bf16.mxu0 %v618_v2  ;;  %196 = vperm.xlu1 %616, %v69_v9   ;;  %v624_v16 = vld [vmem:[#allocation2 + $0x18] sm:$0xff]   ;;  %v625_v17 = vld [vmem:[#allocation2 + $0x20] sm:$0xff]   ;;  %v626_v18 = vld [vmem:[#allocation2 + $0x28] sm:$0xff]   ;;  %p714_p2 = scmp.ne.s32.totalorder %s490_s25, %s713_s26  ;;  %p719_p4 = scmp.lt.s32.totalorder %s713_s26, %s713_s26 }
  0x2b   :  { %186 = vperm.xlu0 %615, %v67_v8   ;;  %567 = vmatprep.subr.bf16.mxu1 %v621_v13  ;;  %v627_v19 = vld [vmem:[#allocation2 + $0x30] sm:$0xff]   ;;  %v628_v20 = vld [vmem:[#allocation2 + $0x38] sm:$0xff]   ;;  %v502_v21 = vld [vmem:[%s884_s3] ss:$0 sm:$0xff] }
  0x2c   :  { %568 = vmatpush3.bf16.msra.mxu1 %v621_v13  ;;  %v629_v56 = vld [vmem:[#allocation5] sm:$0xff]   ;;  %v630_v57 = vld [vmem:[#allocation5 + $0x8] sm:$0xff]   ;;  %v631_v58 = vld [vmem:[#allocation5 + $0x10] sm:$0xff]   ;;  %p720_p5 = por %p719_p4, %p718_p3 }
  0x2d   :  { %562 = vmatpush3.bf16.msra.mxu0 %v618_v2  ;;  %569 = vmatprep.subr.bf16.mxu1 %v622_v14  ;;  %v632_v59 = vld [vmem:[#allocation5 + $0x18] sm:$0xff]   ;;  %v633_v60 = vld [vmem:[#allocation5 + $0x20] sm:$0xff]   ;;  %v634_v61 = vld [vmem:[#allocation5 + $0x28] sm:$0xff]  }
  0x2e   :  { %201 = vperm.xlu1 %616, %v70_v12   ;;  %587 = vmatprep.subr.bf16.mxu0 %v629_v56  ;;  %v635_v62 = vld [vmem:[#allocation5 + $0x30] sm:$0xff]   ;;  %v636_v63 = vld [vmem:[#allocation5 + $0x38] sm:$0xff]   ;;  %v513_v0 = vld [vmem:[%s886_s5] ss:$0 sm:$0xff]  ;;  %p721_p6 = pnand %p720_p5, %p714_p2 }
  0x2f   :  { %191 = vperm.xlu0 %615, %v68_v11  }
  0x30   :  { %564 = vmatmul.mubr.msk.bf16.vlgmr.msra.gmra.mrb[0].mxu0 %vm104_vm0, %v620_v7  ;;  %570 = vmatpush3.bf16.msra.mxu1 %v622_v14 }
  0x31   :  { %571 = vmatprep.subr.bf16.mxu1 %v623_v15  ;;  %588 = vmatpush3.bf16.msra.mxu0 %v629_v56 }
  0x32   :  { %589 = vmatprep.subr.bf16.mxu0 %v630_v57 }
  0x34   :  { %572 = vmatpush3.bf16.msra.mxu1 %v623_v15 }
  0x35   :  { %573 = vmatprep.subr.bf16.mxu1 %v624_v16  ;;  %590 = vmatpush3.bf16.msra.mxu0 %v630_v57 }
  0x36   :  { %591 = vmatprep.subr.bf16.mxu0 %v631_v58 }
  0x38   :  { %574 = vmatpush3.bf16.msra.mxu1 %v624_v16 }
  0x39   :  { %575 = vmatprep.subr.bf16.mxu1 %v625_v17  ;;  %592 = vmatpush3.bf16.msra.mxu0 %v631_v58 }
  0x3a   :  { %593 = vmatprep.subr.bf16.mxu0 %v632_v59 }
  0x3c   :  { %576 = vmatpush3.bf16.msra.mxu1 %v625_v17 }
  0x3d   :  { %577 = vmatprep.subr.bf16.mxu1 %v626_v18  ;;  %594 = vmatpush3.bf16.msra.mxu0 %v632_v59 }
  0x3e   :  { %595 = vmatprep.subr.bf16.mxu0 %v633_v60 }
  0x40   :  { %578 = vmatpush3.bf16.msra.mxu1 %v626_v18 }
  0x41   :  { %579 = vmatprep.subr.bf16.mxu1 %v627_v19  ;;  %596 = vmatpush3.bf16.msra.mxu0 %v633_v60 }
  0x42   :  { %597 = vmatprep.subr.bf16.mxu0 %v634_v61 }
  0x44   :  { %580 = vmatpush3.bf16.msra.mxu1 %v627_v19 }
  0x45   :  { %581 = vmatprep.subr.bf16.mxu1 %v628_v20  ;;  %598 = vmatpush3.bf16.msra.mxu0 %v634_v61 }
  0x46   :  { %599 = vmatprep.subr.bf16.mxu0 %v635_v62 }
  0x48   :  { %582 = vmatpush3.bf16.msra.mxu1 %v628_v20 }
  0x49   :  { %600 = vmatpush3.bf16.msra.mxu0 %v635_v62 }
  0x4a   :  { %601 = vmatprep.subr.bf16.mxu0 %v636_v63 }
  0x4d   :  { %602 = vmatpush3.bf16.msra.mxu0 %v636_v63 }
  0xa9   :  { %v847_v42 = vpop.permute.xlu1 %196 }
  0xaa   :  { %v849_v43 = vpop.permute.xlu0 %186 }
  0xad   :  { %v851_v47 = vpop.permute.xlu1 %201 }
  0xae   :  { %v854_v50 = vpop.permute.xlu0 %191 }
 0x103   :  { %v565_v22 = vpop.f32.mrb[0].mxu0 }
 0x104   :  { %v154_v23 = vadd.f32 %v565_v22, %v502_v21  ;;  %v145_v24 = vpop.f32.mrb[1].mxu0 }
 0x105   :  { %v146_v25 = vadd.f32 %v502_v21, %v145_v24  ;;  %v566_v26 = vpop.f32.mrb[2].mxu0 }
 0x106   :  { %v511_v27 = vmul.f32 -1.442695, %v154_v23  ;;  %v157_v28 = vadd.f32 %v566_v26, %v502_v21  ;;  %v148_v29 = vpop.f32.mrb[3].mxu0 }
 0x107   :  { %v509_v30 = vmul.f32 -1.442695, %v146_v25  ;;  %v149_v31 = vadd.f32 %v502_v21, %v148_v29 }
 0x108   :  { %637 = vpow2.f32 %v511_v27  ;;  %v512_v32 = vmul.f32 -1.442695, %v157_v28 }
 0x109   :  { %639 = vpow2.f32 %v509_v30  ;;  %v510_v33 = vmul.f32 -1.442695, %v149_v31  ;;  %v526_v31 = vld [vmem:[%s888_s7] ss:$0 sm:$0xff] }
 0x10a   :  { %641 = vpow2.f32 %v512_v32 }
 0x10b   :  { %643 = vpow2.f32 %v510_v33 }
 0x112   :  { %v638_v34 = vpop.eup %637 }
 0x113   :  { %v640_v35 = vpop.eup %639  ;;  %v174_v36 = vadd.f32 1.0, %v638_v34 }
 0x114   :  { %v642_v37 = vpop.eup %641  ;;  %v172_v38 = vadd.f32 1.0, %v640_v35 }
 0x115   :  { %v644_v39 = vpop.eup %643  ;;  %645 = vrcp.f32 %v174_v36  ;;  %v175_v40 = vadd.f32 1.0, %v642_v37 }
 0x116   :  { %647 = vrcp.f32 %v172_v38  ;;  %v173_v41 = vadd.f32 1.0, %v644_v39 }
 0x117   :  { %649 = vrcp.f32 %v175_v40 }
 0x118   :  { %651 = vrcp.f32 %v173_v41 }
 0x11f   :  { %v646_v44 = vpop.eup %645 }
 0x120   :  { %v648_v45 = vpop.eup %647  ;;  %v206_v49 = vmul.f32 %v646_v44, %v847_v42 }
 0x121   :  { %v650_v46 = vpop.eup %649  ;;  %v204_v52 = vmul.f32 %v648_v45, %v849_v43 }
 0x122   :  { %v652_v48 = vpop.eup %651  ;;  %v207_v51 = vmul.f32 %v650_v46, %v851_v47 }
 0x123   :  { %v205_v53 = vmul.f32 %v652_v48, %v854_v50 }
 0x124   :  { %v209_v54 = vpack.c.bf16 %v207_v51, %v206_v49 }
 0x125   :  { %v208_v55 = vpack.c.bf16 %v205_v53, %v204_v52 }
 0x127   :  { %583 = vmatprep.mubr.bf16.mxu1 %v208_v55 }
 0x128   :  { %584 = vmatmul.mubr.bf16.vlgmr.msra.gmra.mrb[0].mxu1 %v209_v54 }
 0x1fb   :  { %v585_v1 = vpop.f32.mrb[0].mxu1 }
 0x1fc   :  { %v324_v2 = vadd.f32 %v585_v1, %v513_v0  ;;  %v315_v3 = vpop.f32.mrb[1].mxu1 }
 0x1fd   :  { %v316_v4 = vadd.f32 %v513_v0, %v315_v3  ;;  %v586_v5 = vpop.f32.mrb[2].mxu1 }
 0x1fe   :  { %v524_v6 = vmul.f32 -1.442695, %v324_v2  ;;  %v327_v7 = vadd.f32 %v586_v5, %v513_v0  ;;  %v318_v8 = vpop.f32.mrb[3].mxu1 }
 0x1ff   :  { %v522_v9 = vmul.f32 -1.442695, %v316_v4  ;;  %v319_v10 = vadd.f32 %v513_v0, %v318_v8 }
 0x200   :  { %653 = vpow2.f32 %v524_v6  ;;  %v525_v11 = vmul.f32 -1.442695, %v327_v7 }
 0x201   :  { %655 = vpow2.f32 %v522_v9  ;;  %v523_v12 = vmul.f32 -1.442695, %v319_v10 }
 0x202   :  { %657 = vpow2.f32 %v525_v11 }
 0x203   :  { %659 = vpow2.f32 %v523_v12 }
 0x20a   :  { %v654_v13 = vpop.eup %653 }
 0x20b   :  { %v656_v14 = vpop.eup %655  ;;  %v344_v15 = vadd.f32 1.0, %v654_v13 }
 0x20c   :  { %v658_v16 = vpop.eup %657  ;;  %v342_v17 = vadd.f32 1.0, %v656_v14 }
 0x20d   :  { %v660_v18 = vpop.eup %659  ;;  %661 = vrcp.f32 %v344_v15  ;;  %v345_v19 = vadd.f32 1.0, %v658_v16 }
 0x20e   :  { %663 = vrcp.f32 %v342_v17  ;;  %v343_v20 = vadd.f32 1.0, %v660_v18 }
 0x20f   :  { %665 = vrcp.f32 %v345_v19 }
 0x210   :  { %667 = vrcp.f32 %v343_v20 }
 0x217   :  { %v662_v21 = vpop.eup %661 }
 0x218   :  { %v664_v22 = vpop.eup %663  ;;  %v356_v25 = vmul.f32 %v662_v21, %v847_v42 }
 0x219   :  { %v666_v23 = vpop.eup %665  ;;  %v354_v27 = vmul.f32 %v664_v22, %v849_v43 }
 0x21a   :  { %v668_v24 = vpop.eup %667  ;;  %v357_v26 = vmul.f32 %v666_v23, %v851_v47 }
 0x21b   :  { %v355_v28 = vmul.f32 %v668_v24, %v854_v50 }
 0x21c   :  { %v359_v29 = vpack.c.bf16 %v357_v26, %v356_v25 }
 0x21d   :  { %v358_v30 = vpack.c.bf16 %v355_v28, %v354_v27 }
 0x21f   :  { %603 = vmatprep.mubr.bf16.mxu0 %v358_v30 }
 0x220   :  { %604 = vmatmul.mubr.bf16.vlgmr.msra.gmra.mrb[4].mxu0 %v359_v29 }
 0x2f3   :  { %v605_v32 = vpop.f32.mrb[4].mxu0 }
 0x2f4   :  { %v474_v33 = vadd.f32 %v605_v32, %v526_v31  ;;  %v465_v34 = vpop.f32.mrb[5].mxu0 }
 0x2f5   :  { %v466_v35 = vadd.f32 %v526_v31, %v465_v34  ;;  %v606_v36 = vpop.f32.mrb[6].mxu0 }
 0x2f6   :  { %482 = vst [vmem:[#allocation7 + $0x10] sm:$0xff] %v474_v33  ;;  %v477_v37 = vadd.f32 %v606_v36, %v526_v31  ;;  %v468_v38 = vpop.f32.mrb[7].mxu0 }
 0x2f7   :  { %480 = vst [vmem:[#allocation7] sm:$0xff] %v466_v35  ;;  %v469_v39 = vadd.f32 %v526_v31, %v468_v38 }
 0x2f8   :  { %483 = vst [vmem:[#allocation7 + $0x18] sm:$0xff] %v477_v37 }
 0x2f9   :  { %481 = vst [vmem:[#allocation7 + $0x8] sm:$0xff] %v469_v39 }
 0x2fa   :  { %724 = shalt.err (!%p721_p6)
}
 0x2fb   :  { %s725_s29 = scalar_lea.hbm %s889_s8, 512 }
 0x2fc   :  { %p726_p7 = scmp.ne.s32.totalorder %s889_s8, %s725_s29  ;;  %p729_p8 = scmp.lt.u32.totalorder %s725_s29, %s889_s8 }
 0x2fe   :  { %p731_p9 = pnand %p729_p8, %p726_p7 }
 0x300   :  { %734 = shalt.err (!%p731_p9)
}
 0x301   :  { %s747_s10 = smov 128   ;;  %s748_s11 = smov 8  }
 0x302   :  { %495 = dma.vmem_to_hbm [thread:$0]  %s490_s25, 512, %s889_s8, [#allocation4], %s747_s10, %s747_s10, %s748_s11  }
 0x303   :  { %739 = dma.done.wait [#allocation4], 512  }
 0x304   :  { %740 = vsyncadd [#allocation4], 4294966784 }
 0x305   :  { %499 = vsyncpa [#allocation3], 1 }
 0x306   :  { %500 = vsyncpa [#allocation6], 1 }
 0x307   :  { %501 = vsyncpa [#allocation4], 1 }

</bundles_post_ra>
